<compile_context>
chip_gen: v7x
topology: tpu7x:2x2x1
jax: 0.10.0
libtpu: 0.0.40
codegen_flags: <defaults>
</compile_context>

<pallas_src>
import functools

import jax
import jax.numpy as jnp
from jax import lax
from jax.experimental import pallas as pl
from jax.experimental.pallas import tpu as pltpu

LANES = 128


def _var_kernel(x_ref, mean_ref, o_ref, acc_ref, *, num_k, strips_full,
                strips_last, tail_last, inv_numel, unroll):
    """Grid = (C tiles, M tiles).  Axis 1 (M) is the reduction axis; a
    lane-dense (tile_c, 128) f32 scratch is the resident accumulator and the
    (tile_c, 1) output block is written only at the final reduction step."""
    k = pl.program_id(1)

    m = mean_ref[...]  # (tile_c, 128) f32, already lane-broadcast in the wrapper

    def strip_body(j, acc):
        off = pl.multiple_of(j * LANES, LANES)
        x = x_ref[:, pl.ds(off, LANES)].astype(jnp.float32)
        d = x - m
        return acc + d * d

    def accumulate(n_strips, tail):
        # n_strips / tail are static Python ints.
        if n_strips > 0:
            part = lax.fori_loop(0, n_strips, strip_body,
                                 jnp.zeros_like(acc_ref),
                                 unroll=max(1, min(unroll, n_strips)))
            acc_ref[...] += part
        if tail:
            # Statically-sized partial strip (< 128 lanes); jnp ops are plain
            # selectless elementwise work, masked stores handle the lanes.
            s0 = n_strips * LANES
            xt = x_ref[:, s0:s0 + tail].astype(jnp.float32)
            dt = xt - m[:, :tail]
            acc_ref[:, :tail] += dt * dt

    def finalize():
        # Single cross-lane reduce + 1/M scale per channel tile.
        var = jnp.sum(acc_ref[...], axis=1, keepdims=True) * inv_numel
        o_ref[...] = var.astype(o_ref.dtype)

    if num_k == 1:
        # Whole reduction axis in one block: no pl.when gating needed.
        acc_ref[...] = jnp.zeros_like(acc_ref)
        accumulate(strips_last, tail_last)
        finalize()
        return

    @pl.when(k == 0)
    def _init():
        acc_ref[...] = jnp.zeros_like(acc_ref)

    if strips_last == strips_full and tail_last == 0:
        # Uniform hot path: every step processes the same full-width block.
        accumulate(strips_full, 0)

        @pl.when(k == num_k - 1)
        def _fin():
            finalize()
    else:
        @pl.when(k < num_k - 1)
        def _full_steps():
            accumulate(strips_full, 0)

        @pl.when(k == num_k - 1)
        def _last_step():
            # Accumulate the (partially valid) last block and finalize in the
            # SAME pl.when block (reviewer correctness note).
            accumulate(strips_last, tail_last)
            finalize()


def _default_block_bytes():
    """Byte budget per input block: ~4 MiB on v7x (64 MiB physical VMEM),
    ~8 MiB on 128-MiB-VMEM parts (v4/v5e/v6e)."""
    try:
        kind = jax.devices()[0].device_kind.lower()
    except Exception:  # pragma: no cover
        return 4 * 1024 * 1024
    if "v7" in kind:
        return 4 * 1024 * 1024
    return 8 * 1024 * 1024


def _pick_tile_c(C, itemsize, want_split):
    """Channel tile: a divisor of C aligned to the dtype's sublane packing
    (8 rows f32, 16 bf16, 32 int8), capped at 64 rows so the strip loop's
    carry/mean/strip vregs fit comfortably in the 64-entry register file."""
    pack = 8 * max(1, 4 // max(1, itemsize))
    if C % pack != 0:
        # TODO(synk): pad C up to the packing multiple instead of taking the
        # odd full-C block (wastes packed sublanes on the bf16/int8 path).
        return C
    cap = 64
    if want_split:
        # Leave at least two channel blocks so a core-parallel axis has work.
        cap = min(cap, max(pack, C // 2))
    best = pack
    for cand in range(pack, min(C, cap) + 1, pack):
        if C % cand == 0:
            best = cand
    return best


def _pick_tile_m(M, tile_c, itemsize, target_block_bytes):
    """Reduction tile: sized from a byte budget (not a fixed column count),
    rounded to 128 lanes, preferring a divisor of M so rem == 0."""
    row_bytes = max(1, tile_c * itemsize)
    if M * row_bytes <= target_block_bytes or M <= LANES:
        return M  # whole reduction axis fits in one block
    cols = max(LANES, (target_block_bytes // row_bytes) // LANES * LANES)
    if cols >= M:
        return M
    for cand in range(cols, LANES - 1, -LANES):
        if cols - cand > 8 * LANES:
            break
        if M % cand == 0:
            return cand
    return cols


def subnet_var(input_, mean, *, target_block_bytes=None, core_parallel=False):
    """JAX wrapper reproducing SubNet_Var.forward(input_, mean).

    input_: (C, M) array (f32 or bf16), channel-major, M = N*H*W
    mean:   (C,)   per-channel mean
    returns (C,) float32 variance per channel.
    """
    C, M = input_.shape
    assert mean.shape == (C,)
    itemsize = jnp.dtype(input_.dtype).itemsize

    if target_block_bytes is None:
        target_block_bytes = _default_block_bytes()

    tile_c = _pick_tile_c(C, itemsize, want_split=core_parallel)
    grid_c = C // tile_c
    tile_m = _pick_tile_m(M, tile_c, itemsize, int(target_block_bytes))
    grid_m = pl.cdiv(M, tile_m)

    last_cols = M - (grid_m - 1) * tile_m
    strips_full, tail_full = divmod(tile_m, LANES)
    strips_last, tail_last = divmod(last_cols, LANES)
    # grid_m > 1 implies tile_m is a multiple of 128 (enforced by _pick_tile_m),
    # so any partial strip can only live in the last block.
    assert grid_m == 1 or tail_full == 0

    # Unroll factor for the strip loop, bounded by vreg pressure (tile_c rows).
    unroll = max(1, min(8, 128 // max(1, tile_c)))

    # Pre-broadcast + pre-cast the mean to a lane-dense f32 block (C*512 bytes).
    mean_b = jnp.broadcast_to(mean.astype(jnp.float32).reshape(C, 1), (C, LANES))

    kernel = functools.partial(
        _var_kernel,
        num_k=int(grid_m),
        strips_full=int(strips_full),
        strips_last=int(strips_last),
        tail_last=int(tail_last),
        inv_numel=1.0 / float(M),
        unroll=int(unroll),
    )

    block_bytes = tile_c * tile_m * itemsize
    vmem_need = 2 * block_bytes + 3 * tile_c * LANES * 4 + 2 * tile_c * 4
    vmem_limit = int(min(64 * 1024 * 1024,
                         max(32 * 1024 * 1024, int(vmem_need * 1.25))))

    sem0 = "parallel"
    if core_parallel and grid_c > 1:
        sem0 = pltpu.CORE_PARALLEL  # shard channel blocks across v7x's two TCs
    # TODO(synk): when core_parallel is requested but grid_c == 1 (tiny C),
    # add a size-2 core-parallel axis splitting M with per-core partial sums
    # combined in the wrapper; not needed for the shapes exercised here.

    cost = pl.CostEstimate(
        flops=3 * C * M,
        transcendentals=0,
        bytes_accessed=C * M * itemsize + C * LANES * 4 + C * 4,
    )

    out = pl.pallas_call(
        kernel,
        out_shape=jax.ShapeDtypeStruct((C, 1), jnp.float32),
        grid_spec=pltpu.PrefetchScalarGridSpec(
            num_scalar_prefetch=0,
            grid=(grid_c, grid_m),
            in_specs=[
                # (tile_c, tile_m) slab of input, marching along M per channel tile
                pl.BlockSpec((tile_c, tile_m), lambda c, k: (c, k)),
                # lane-dense per-channel mean, resident across the reduction axis
                pl.BlockSpec((tile_c, LANES), lambda c, k: (c, 0)),
            ],
            # output block identical across k -> resident in VMEM until finalize
            out_specs=pl.BlockSpec((tile_c, 1), lambda c, k: (c, 0)),
            scratch_shapes=[pltpu.VMEM((tile_c, LANES), jnp.float32)],
        ),
        compiler_params=pltpu.CompilerParams(
            dimension_semantics=(sem0, "arbitrary"),
            vmem_limit_bytes=vmem_limit,
        ),
        cost_estimate=cost,
    )(input_, mean_b)

    return out.reshape(C)


def subnet_var_ref(input_, mean):
    """Pure-JAX reference matching the PyTorch module exactly."""
    bias_var1 = input_ - mean[:, None]
    numel = bias_var1.shape[1]
    return jnp.sum(jnp.square(bias_var1) / numel, axis=1)


if __name__ == "__main__":
    # Small shapes consistent with the module: batch=2, channels=4, spatial=16.
    # The module's forward takes channel-major data (mean.unsqueeze(1) broadcasts
    # along dim 1), i.e. input_ is (C, N*H*W) = (4, 512); build it directly in
    # that layout so no extra HBM transpose precedes the kernel.
    key = jax.random.PRNGKey(0)
    C, N, H, W = 4, 2, 16, 16
    M = N * H * W

    x = jax.random.normal(key, (C, M), dtype=jnp.float32)
    mean = jnp.mean(x, axis=1)  # per-channel mean (what the parent net would feed)

    out = jax.block_until_ready(subnet_var(x, mean))
    ref = subnet_var_ref(x, mean)

    assert out.shape == (C,)
    assert jnp.allclose(out, ref, atol=1e-5, rtol=1e-5), (out, ref)

    print("KERNEL_OK")
</pallas_src>

<mosaic_0001>
module attributes {stable_mosaic.version = 11 : i64} {
  func.func @_var_kernel(%arg0: i32, %arg1: i32, %arg2: memref<4x512xf32, #tpu.memory_space<vmem>>, %arg3: memref<4x128xf32, #tpu.memory_space<vmem>>, %arg4: memref<4x1xf32, #tpu.memory_space<vmem>>, %arg5: memref<4x128xf32, #tpu.memory_space<vmem>>) attributes {dimension_semantics = [#tpu.dimension_semantics<parallel>, #tpu.dimension_semantics<arbitrary>], iteration_bounds = array<i64: 1, 1>, scalar_prefetch = 0 : i64, scratch_operands = 1 : i64, tpu.core_type = #tpu.core_type<tc>, window_params = [{transform_indices = @transform_0, window_bounds = array<i64: 4, 512>}, {transform_indices = @transform_1, window_bounds = array<i64: 4, 128>}, {transform_indices = @transform_2, window_bounds = array<i64: 4, 1>}]} {
    %c0 = arith.constant 0 : index
    %c0_0 = arith.constant 0 : index
    %0 = vector.load %arg3[%c0, %c0_0] : memref<4x128xf32, #tpu.memory_space<vmem>>, vector<4x128xf32>
    %cst = arith.constant 0.000000e+00 : f32
    %1 = vector.broadcast %cst : f32 to vector<4x128xf32>
    %c0_1 = arith.constant 0 : index
    %c0_2 = arith.constant 0 : index
    %2 = vector.load %arg5[%c0_1, %c0_2] : memref<4x128xf32, #tpu.memory_space<vmem>>, vector<4x128xf32>
    tpu.vector_store %arg5[%c0_1, %c0_2], %1 {strides = array<i32>} : memref<4x128xf32, #tpu.memory_space<vmem>>, vector<4x128xf32>,
    %cst_3 = arith.constant 0.000000e+00 : f32
    %3 = vector.broadcast %cst_3 : f32 to vector<4x128xf32>
    %c0_i32 = arith.constant 0 : i32
    %c128_i32 = arith.constant 128 : i32
    %4 = arith.muli %c0_i32, %c128_i32 : i32
    %5 = tpu.assume_multiple %4, 128 : i32
    %c0_4 = arith.constant 0 : index
    %6 = arith.index_cast %5 : i32 to index
    %7 = vector.load %arg2[%c0_4, %6] : memref<4x512xf32, #tpu.memory_space<vmem>>, vector<4x128xf32>
    %8 = arith.subf %7, %0 : vector<4x128xf32>
    %9 = arith.mulf %8, %8 : vector<4x128xf32>
    %10 = arith.addf %3, %9 : vector<4x128xf32>
    %c1_i32 = arith.constant 1 : i32
    %c128_i32_5 = arith.constant 128 : i32
    %11 = arith.muli %c1_i32, %c128_i32_5 : i32
    %12 = tpu.assume_multiple %11, 128 : i32
    %c0_6 = arith.constant 0 : index
    %13 = arith.index_cast %12 : i32 to index
    %14 = vector.load %arg2[%c0_6, %13] : memref<4x512xf32, #tpu.memory_space<vmem>>, vector<4x128xf32>
    %15 = arith.subf %14, %0 : vector<4x128xf32>
    %16 = arith.mulf %15, %15 : vector<4x128xf32>
    %17 = arith.addf %10, %16 : vector<4x128xf32>
    %c2_i32 = arith.constant 2 : i32
    %c128_i32_7 = arith.constant 128 : i32
    %18 = arith.muli %c2_i32, %c128_i32_7 : i32
    %19 = tpu.assume_multiple %18, 128 : i32
    %c0_8 = arith.constant 0 : index
    %20 = arith.index_cast %19 : i32 to index
    %21 = vector.load %arg2[%c0_8, %20] : memref<4x512xf32, #tpu.memory_space<vmem>>, vector<4x128xf32>
    %22 = arith.subf %21, %0 : vector<4x128xf32>
    %23 = arith.mulf %22, %22 : vector<4x128xf32>
    %24 = arith.addf %17, %23 : vector<4x128xf32>
    %c3_i32 = arith.constant 3 : i32
    %c128_i32_9 = arith.constant 128 : i32
    %25 = arith.muli %c3_i32, %c128_i32_9 : i32
    %26 = tpu.assume_multiple %25, 128 : i32
    %c0_10 = arith.constant 0 : index
    %27 = arith.index_cast %26 : i32 to index
    %28 = vector.load %arg2[%c0_10, %27] : memref<4x512xf32, #tpu.memory_space<vmem>>, vector<4x128xf32>
    %29 = arith.subf %28, %0 : vector<4x128xf32>
    %30 = arith.mulf %29, %29 : vector<4x128xf32>
    %31 = arith.addf %24, %30 : vector<4x128xf32>
    %c4_i32 = arith.constant 4 : i32
    %c0_11 = arith.constant 0 : index
    %c0_12 = arith.constant 0 : index
    %32 = vector.load %arg5[%c0_11, %c0_12] : memref<4x128xf32, #tpu.memory_space<vmem>>, vector<4x128xf32>
    %33 = arith.addf %32, %31 : vector<4x128xf32>
    %c0_13 = arith.constant 0 : index
    %c0_14 = arith.constant 0 : index
    %34 = vector.load %arg5[%c0_13, %c0_14] : memref<4x128xf32, #tpu.memory_space<vmem>>, vector<4x128xf32>
    tpu.vector_store %arg5[%c0_13, %c0_14], %33 {strides = array<i32>} : memref<4x128xf32, #tpu.memory_space<vmem>>, vector<4x128xf32>,
    %c0_15 = arith.constant 0 : index
    %c0_16 = arith.constant 0 : index
    %35 = vector.load %arg5[%c0_15, %c0_16] : memref<4x128xf32, #tpu.memory_space<vmem>>, vector<4x128xf32>
    %cst_17 = arith.constant dense<0.000000e+00> : vector<4xf32>
    %36 = vector.multi_reduction <add>, %35, %cst_17 [1] : vector<4x128xf32> to vector<4xf32>
    %37 = vector.shape_cast %36 : vector<4xf32> to vector<4x1xf32>
    %cst_18 = arith.constant 0.001953125 : f32
    %38 = vector.broadcast %cst_18 : f32 to vector<4x1xf32>
    %39 = arith.mulf %37, %38 : vector<4x1xf32>
    %c0_19 = arith.constant 0 : index
    %c0_20 = arith.constant 0 : index
    %40 = vector.load %arg4[%c0_19, %c0_20] : memref<4x1xf32, #tpu.memory_space<vmem>>, vector<4x1xf32>
    tpu.vector_store %arg4[%c0_19, %c0_20], %39 {strides = array<i32>} : memref<4x1xf32, #tpu.memory_space<vmem>>, vector<4x1xf32>,
    return
  }
  func.func @transform_0(%arg0: i32, %arg1: i32) -> (i32, i32) {
    %c0_i32 = arith.constant 0 : i32
    return %arg0, %arg1 : i32, i32
  }
  func.func @transform_1(%arg0: i32, %arg1: i32) -> (i32, i32) {
    %c0_i32 = arith.constant 0 : i32
    %c0_i32_0 = arith.constant 0 : i32
    return %arg0, %c0_i32 : i32, i32
  }
  func.func @transform_2(%arg0: i32, %arg1: i32) -> (i32, i32) {
    %c0_i32 = arith.constant 0 : i32
    %c0_i32_0 = arith.constant 0 : i32
    return %arg0, %c0_i32 : i32, i32
  }
}

</mosaic_0001>

<bundles_post_ra>
// kernel: tpu_custom_call.1
= control target key start
LH: loop header
LB: loop body
LE: loop exit
PB: predicated region body
PF: predicated region fallthrough
CT: control target
= control target key end

     0   :  { %7 = vsyncpa [#allocation4], 0  ;;  %s169_s0 = inlined_call_operand.hbm [shape: f32[4,512], index: 0, kind: input, shape index: {}]   ;;  %s170_s1 = inlined_call_operand.hbm [shape: f32[4,128], index: 1, kind: input, shape index: {}]   ;;  %s171_s2 = inlined_call_operand.vmem [shape: f32[4,1], index: 2, kind: output, shape index: {}]  }
   0x1   :  { %8 = vsyncpa [#allocation6], 0  ;;  %s124_s9 = smov [#allocation3]   ;;  %s125_s11 = smov [#allocation5]  }
   0x2   :  { %s15_s10 = sshll.u32 %s124_s9, 4  ;;  %s25_s12 = sshll.u32 %s125_s11, 4  ;;  %s16_s10 = int_to_ptr.vmem [resolvable:$true] %s15_s10  ;;  %s26_s12 = int_to_ptr.vmem [resolvable:$true] %s25_s12 }
   0x3   :  { %s76_s15 = scalar_lea.hbm %s169_s0, 256 }
   0x4   :  { %p77_p0 = scmp.ne.s32.totalorder %s169_s0, %s76_s15  ;;  %p80_p1 = scmp.lt.u32.totalorder %s76_s15, %s169_s0 }
   0x6   :  { %p82_p2 = pnand %p80_p1, %p77_p0 }
   0x8   :  { %85 = shalt.err (!%p82_p2)
}
   0x9   :  { %s86_s20 = scalar_lea.vmem %s16_s10, 256  ;;  %p91_p4 = scmp.lt.s32.totalorder %s16_s10, %s16_s10 }
   0xa   :  { %p87_p3 = scmp.ne.s32.totalorder %s16_s10, %s86_s20  ;;  %p92_p5 = scmp.lt.s32.totalorder %s86_s20, %s86_s20 }
   0xc   :  { %p93_p6 = por %p92_p5, %p91_p4 }
   0xe   :  { %p94_p7 = pnand %p93_p6, %p87_p3 }
  0x10   :  { %97 = shalt.err (!%p94_p7)
}
  0x11   :  { %18 = dma.hbm_to_vmem [thread:$0]  %s169_s0, 256, %s16_s10, [#allocation4]  }
  0x12   :  { %s98_s25 = scalar_lea.hbm %s170_s1, 64 }
  0x13   :  { %p99_p8 = scmp.ne.s32.totalorder %s170_s1, %s98_s25  ;;  %p102_p9 = scmp.lt.u32.totalorder %s98_s25, %s170_s1 }
  0x15   :  { %p104_p10 = pnand %p102_p9, %p99_p8 }
  0x17   :  { %107 = shalt.err (!%p104_p10)
}
  0x18   :  { %s108_s30 = scalar_lea.vmem %s26_s12, 64  ;;  %p113_p12 = scmp.lt.s32.totalorder %s26_s12, %s26_s12 }
  0x19   :  { %p109_p11 = scmp.ne.s32.totalorder %s26_s12, %s108_s30  ;;  %p114_p13 = scmp.lt.s32.totalorder %s108_s30, %s108_s30 }
  0x1b   :  { %p115_p0 = por %p114_p13, %p113_p12 }
  0x1d   :  { %p116_p1 = pnand %p115_p0, %p109_p11 }
  0x1f   :  { %119 = shalt.err (!%p116_p1)
}
  0x20   :  { %28 = dma.hbm_to_vmem [thread:$0]  %s170_s1, 64, %s26_s12, [#allocation6]  }
  0x21   :  { %120 = dma.done.wait [#allocation4], 256  }
  0x22   :  { %121 = vsyncadd [#allocation4], 4294967040 }
  0x23   :  { %122 = dma.done.wait [#allocation6], 64  }
  0x24   :  { %123 = vsyncadd [#allocation6], 4294967232  ;;  %v126_v0 = vmov 0.0   ;;  %v35_v1 = vld [vmem:[#allocation5] sm:$0xf]  ;;  %vm60_vm0 = vcmask 1043456  }
  0x25   :  { %36 = vst [vmem:[#allocation2] sm:$0xf] %v126_v0  ;;  %v37_v2 = vld [vmem:[#allocation3] sm:$0xf]  ;;  %v42_v3 = vld [vmem:[#allocation3 + $0x4] sm:$0xf] }
  0x26   :  { %v38_v4 = vsub.f32 %v37_v2, %v35_v1  ;;  %v43_v5 = vsub.f32 %v42_v3, %v35_v1  ;;  %v47_v6 = vld [vmem:[#allocation3 + $0x8] sm:$0xf]  ;;  %v52_v7 = vld [vmem:[#allocation3 + $0xc] sm:$0xf]  ;;  %vm65_vm1 = vcmask 3072  }
  0x27   :  { %v48_v8 = vsub.f32 %v47_v6, %v35_v1  ;;  %v53_v9 = vsub.f32 %v52_v7, %v35_v1 }
  0x28   :  { %v39_v10 = vmul.f32 %v38_v4, %v38_v4  ;;  %v44_v11 = vmul.f32 %v43_v5, %v43_v5 }
  0x29   :  { %v49_v12 = vmul.f32 %v48_v8, %v48_v8  ;;  %v54_v14 = vmul.f32 %v53_v9, %v53_v9 }
  0x2a   :  { %v45_v13 = vadd.f32 %v44_v11, %v39_v10 }
  0x2c   :  { %v50_v15 = vadd.f32 %v49_v12, %v45_v13  ;;  %v56_v16 = vld [vmem:[#allocation2] sm:$0xf] }
  0x2e   :  { %v55_v17 = vadd.f32 %v54_v14, %v50_v15 }
  0x30   :  { %v57_v18 = vadd.f32 %v56_v16, %v55_v17 }
  0x32   :  { %58 = vst [vmem:[#allocation2] sm:$0xf] %v57_v18 }
  0x39   :  { %v59_v19 = vld [vmem:[#allocation2] sm:$0xf] }
  0x3a   :  { %v61_v20 = vsel %vm60_vm0, %v59_v19, 0.0 }
  0x3b   :  { %62 = vadd.xlane.f32.xlu0 %v61_v20 }
  0xc8   :  { %v63_v21 = vpop.xlane.xlu0 %62 }
  0xc9   :  { %v64_v22 = vmul.f32 0.001953125, %v63_v21 }
  0xcb   :  { %66 = vst.msk [vmem:[%s171_s2] sm:$0xf] %vm65_vm1, %v64_v22 }
  0xcc   :  { %71 = vsyncpa [#allocation4], 1 }
  0xcd   :  { %72 = vsyncpa [#allocation6], 1 }

</bundles_post_ra>
